<compile_context>
chip_gen: v6e
topology: v6e:2x2x1
jax: 0.10.0
libtpu: 0.0.40
codegen_flags: <defaults>
</compile_context>

<pallas_src>
import functools

import jax
import jax.numpy as jnp
from jax import lax
from jax.experimental import pallas as pl
from jax.experimental.pallas import tpu as pltpu


# ---------------------------------------------------------------------------
# Kernel
# ---------------------------------------------------------------------------
def _basic_block_kernel(x_ref, w1_ref, w2_ref, bias_ref, o_ref, pad_ref,
                        *, batch, height, width, channels):
    """One block of `batch` images per grid step, everything resident in VMEM.

    x_ref   : (B*H, W*C)        input rows interleaved (h, b), lanes (w, c)
    w1_ref  : (3*(W+2)*C, W*C)  conv1 banded im2col weights (BN1 scale folded)
    w2_ref  : (3*(W+2)*C, W*C)  conv2 banded im2col weights (BN2 scale folded)
    bias_ref: (2, W*C)          folded BN1 / BN2 biases (tiled over W)
    o_ref   : (B*H, W*C)        output
    pad_ref : ((H+2)*B, (W+2)*C) persistent VMEM scratch with a zero halo
    """
    B, H, W, C = batch, height, width, channels
    HB = H * B
    WC = W * C
    PC = (W + 2) * C
    cdt = pad_ref.dtype

    # Zero only the 1-pixel halo: top/bottom padded rows (h_pad = 0 and H+1,
    # i.e. the first/last B rows) and the left/right padded column strips.
    # Done every grid step (not just program_id == 0) so it stays correct when
    # the "parallel" batch axis is split across TensorCores, each of which owns
    # a private scratch instance and may never execute step 0.
    pad_ref[0:B, :] = jnp.zeros((B, PC), cdt)
    pad_ref[(H + 1) * B:(H + 2) * B, :] = jnp.zeros((B, PC), cdt)
    pad_ref[:, 0:C] = jnp.zeros(((H + 2) * B, C), cdt)
    pad_ref[:, (W + 1) * C:PC] = jnp.zeros(((H + 2) * B, C), cdt)

    x = x_ref[...]                                    # (B*H, W*C) float32

    def conv3x3(w_ref):
        # Banded im2col: 3 accumulated MXU matmuls (one per kernel row kh).
        # The kh shift is a pure sublane offset of kh*B rows: no lane rotates
        # and no (rows, 9*W*C) patch materialization.
        acc = jnp.zeros((HB, WC), jnp.float32)
        for kh in range(3):
            lhs = pad_ref[kh * B:kh * B + HB, :]              # (B*H, (W+2)*C)
            acc += jnp.dot(lhs, w_ref[kh * PC:(kh + 1) * PC, :],
                           preferred_element_type=jnp.float32)
        return acc

    # ---- conv1 (BN1 scale folded into weights) + bias + ReLU ---------------
    pad_ref[B:B + HB, C:C + WC] = x.astype(cdt)
    h = jnp.maximum(conv3x3(w1_ref) + bias_ref[0:1, :], 0.0)

    # stride == 1 -> self.pool is nn.Identity()
    # TODO(synk): stride > 1 (AvgPool2d pool + downsample) and H-axis tiling
    # for very large images are not implemented.

    # ---- conv2 (BN2 scale folded) + bias + residual add + ReLU -------------
    pad_ref[B:B + HB, C:C + WC] = h.astype(cdt)
    out = conv3x3(w2_ref) + bias_ref[1:2, :] + x      # identity = x
    o_ref[...] = jnp.maximum(out, 0.0).astype(o_ref.dtype)


# ---------------------------------------------------------------------------
# Host-side helpers
# ---------------------------------------------------------------------------
def _fold_bn(gamma, beta, mean, var, eps=1e-5):
    scale = gamma / jnp.sqrt(var + eps)
    bias = beta - mean * scale
    return scale, bias


def _banded_conv_weights(w_oihw, out_scale, width, dtype):
    """(O, I, 3, 3) conv weight + per-output-channel scale -> banded im2col.

    Returns (3*(W+2)*I, W*O): one ((W+2)*I, W*O) band per kernel row kh with
    Band[kh][wp*I + i, w*O + o] = scale[o] * W[o, i, kh, wp - w] for
    wp - w in {0, 1, 2}, else 0.  Multiplying the zero-padded activation plane
    (rows, (W+2)*I) by Band[kh] and summing over kh yields the 3x3 / stride-1 /
    pad-1 conv output in (rows, W*O) layout.
    """
    c_out, c_in = w_oihw.shape[0], w_oihw.shape[1]
    taps = jnp.transpose(w_oihw, (2, 3, 1, 0)).astype(jnp.float32)  # (3,3,I,O)
    taps = taps * out_scale.astype(jnp.float32)                     # fold BN
    wp = jnp.arange(width + 2)[:, None]
    w = jnp.arange(width)[None, :]
    kw = wp - w                                                     # (W+2, W)
    valid = ((kw >= 0) & (kw <= 2)).astype(jnp.float32)
    band = taps[:, jnp.clip(kw, 0, 2)]                 # (3, W+2, W, I, O)
    band = band * valid[None, :, :, None, None]
    band = jnp.transpose(band, (0, 1, 3, 2, 4))        # (3, W+2, I, W, O)
    return band.reshape(3 * (width + 2) * c_in, width * c_out).astype(dtype)


def _pick_block_batch(n, h, target_rows=256, min_steps=2):
    """Images per grid step: make matmul M = B*H ~ target_rows while keeping
    >= min_steps grid steps (v7x has 2 TensorCores sharing the "parallel"
    axis, and a couple of steps hide the step-0 weight DMA)."""
    divisors = [b for b in range(1, n + 1) if n % b == 0]
    good = [b for b in divisors if b * h <= target_rows and n // b >= min_steps]
    if good:
        return max(good)
    good = [b for b in divisors if b * h <= target_rows]
    return max(good) if good else 1


def _grid_invariant_spec(block_shape, index_map):
    """BlockSpec for operands whose block never changes across the grid:
    single-buffer them (default double-buffering would only waste VMEM)."""
    try:
        return pl.BlockSpec(block_shape, index_map, pipeline_mode=pl.Buffered(1))
    except (TypeError, AttributeError):   # older jax without pipeline_mode
        return pl.BlockSpec(block_shape, index_map)


# ---------------------------------------------------------------------------
# Public wrapper
# ---------------------------------------------------------------------------
@functools.partial(jax.jit, static_argnames=("compute_dtype", "block_batch"))
def basic_block_ap(x_nchw, w1_oihw, bn1, w2_oihw, bn2, *,
                   compute_dtype=jnp.bfloat16, block_batch=None, eps=1e-5):
    """Forward of BasicBlockAP (stride=1, downsample=None).  NCHW in/out (f32).

    compute_dtype: dtype of the MXU operands (banded weights + padded
    activations); accumulation and the bias/ReLU/residual epilogue stay f32.
    bfloat16 (default) halves HBM/VMEM traffic and doubles MXU throughput;
    use jnp.float32 for bit-level parity with the f32 PyTorch module.
    """
    N, Cin, H, W = x_nchw.shape
    Cm = w1_oihw.shape[0]
    assert Cin == Cm, "stride=1 / downsample=None requires inplanes == planes"
    # Lane-density note: stores are unmasked when W*C is a multiple of 128
    # (true at the validated shape); other shapes remain correct but use
    # masked stores on the lane remainder.

    B = block_batch if block_batch is not None else _pick_block_batch(N, H)
    assert N % B == 0, "block_batch must divide the batch size"
    G = N // B
    HB, WC, PC = H * B, W * Cm, (W + 2) * Cin

    # Fold BN scale into the conv weights (in f32), keep only a bias.
    s1, b1 = _fold_bn(*bn1, eps=eps)
    s2, b2 = _fold_bn(*bn2, eps=eps)
    w1b = _banded_conv_weights(w1_oihw, s1, W, compute_dtype)   # (3*PC, WC)
    w2b = _banded_conv_weights(w2_oihw, s2, W, compute_dtype)
    # Per-channel biases tiled over W (lane = w*C + o), packed into one input.
    bias = jnp.stack([jnp.tile(b1.astype(jnp.float32), W),
                      jnp.tile(b2.astype(jnp.float32), W)])     # (2, WC)

    # NCHW -> blocks of B images with rows interleaved as (h, b) and lanes as
    # (w, c): row = (g*H + h)*B + b, lane = w*C + c.  With this layout the kh
    # shift inside the kernel is a contiguous sublane slice, so the kernel is
    # purely rank-2 (no in-kernel reshapes or per-image loops).
    x = x_nchw.astype(jnp.float32).reshape(G, B, Cin, H, W)
    x = jnp.transpose(x, (0, 3, 1, 4, 2))             # (G, H, B, W, C)
    x = x.reshape(G * HB, WC)

    out_flat = pl.pallas_call(
        functools.partial(_basic_block_kernel, batch=B, height=H, width=W,
                          channels=Cm),
        out_shape=jax.ShapeDtypeStruct((G * HB, WC), jnp.float32),
        grid_spec=pltpu.PrefetchScalarGridSpec(
            num_scalar_prefetch=0,
            grid=(G,),
            in_specs=[
                pl.BlockSpec((HB, WC), lambda g: (g, 0)),
                _grid_invariant_spec((3 * PC, WC), lambda g: (0, 0)),
                _grid_invariant_spec((3 * PC, WC), lambda g: (0, 0)),
                _grid_invariant_spec((2, WC), lambda g: (0, 0)),
            ],
            out_specs=pl.BlockSpec((HB, WC), lambda g: (g, 0)),
            scratch_shapes=[pltpu.VMEM(((H + 2) * B, PC), compute_dtype)],
        ),
        compiler_params=pltpu.CompilerParams(
            dimension_semantics=("parallel",),
            # Actual residency is ~1 MiB at the validated shape (bf16 weights
            # ~220 KiB single-buffered + activation blocks + scratch); 32 MiB
            # leaves ample headroom and fits v7x's 64 MiB physical VMEM.
            vmem_limit_bytes=32 * 1024 * 1024),
    )(x, w1b, w2b, bias)

    out = out_flat.reshape(G, H, B, W, Cm)
    out = jnp.transpose(out, (0, 2, 4, 1, 3))         # (G, B, C, H, W)
    return out.reshape(N, Cm, H, W)


# ---------------------------------------------------------------------------
# Pure-JAX reference (mirrors the PyTorch module in eval mode) for validation.
# ---------------------------------------------------------------------------
def _reference(x, w1, bn1, w2, bn2, eps=1e-5):
    def conv(a, w):
        return lax.conv_general_dilated(
            a, w, window_strides=(1, 1), padding=((1, 1), (1, 1)),
            dimension_numbers=("NCHW", "OIHW", "NCHW"))

    def bn(a, g, b, m, v):
        g, b, m, v = (t[None, :, None, None] for t in (g, b, m, v))
        return (a - m) / jnp.sqrt(v + eps) * g + b

    out = jnp.maximum(bn(conv(x, w1), *bn1), 0.0)
    out = bn(conv(out, w2), *bn2)
    out = out + x                     # downsample is None, identity = x
    return jnp.maximum(out, 0.0)


if __name__ == "__main__":
    key = jax.random.PRNGKey(0)
    k_x, k_w1, k_w2, k_b1, k_b2 = jax.random.split(key, 5)

    N, C, H, W = 4, 8, 16, 16         # inplanes = planes = 8, stride = 1
    x = jax.random.normal(k_x, (N, C, H, W), jnp.float32)
    w1 = 0.1 * jax.random.normal(k_w1, (C, C, 3, 3), jnp.float32)
    w2 = 0.1 * jax.random.normal(k_w2, (C, C, 3, 3), jnp.float32)

    def make_bn(k):
        kg, kb, km, kv = jax.random.split(k, 4)
        gamma = 1.0 + 0.1 * jax.random.normal(kg, (C,), jnp.float32)
        beta = 0.1 * jax.random.normal(kb, (C,), jnp.float32)
        mean = 0.1 * jax.random.normal(km, (C,), jnp.float32)
        var = 0.5 + 0.5 * jnp.abs(jax.random.normal(kv, (C,), jnp.float32))
        return (gamma, beta, mean, var)

    bn1, bn2 = make_bn(k_b1), make_bn(k_b2)
    ref = _reference(x, w1, bn1, w2, bn2)

    # f32 MXU operands: strict check vs the f32 reference (auto block_batch
    # picks B=2 here -> grid of 2 steps, matmul M = B*H = 32).
    out_f32 = jax.block_until_ready(
        basic_block_ap(x, w1, bn1, w2, bn2, compute_dtype=jnp.float32))
    assert out_f32.shape == (N, C, H, W)
    err32 = float(jnp.max(jnp.abs(out_f32 - ref)))
    assert jnp.allclose(out_f32, ref, rtol=1e-4, atol=1e-4), err32

    # Single-image-per-step path (B=1) must also match exactly.
    out_b1 = jax.block_until_ready(
        basic_block_ap(x, w1, bn1, w2, bn2, compute_dtype=jnp.float32,
                       block_batch=1))
    errb1 = float(jnp.max(jnp.abs(out_b1 - ref)))
    assert jnp.allclose(out_b1, ref, rtol=1e-4, atol=1e-4), errb1

    # Default bfloat16 MXU-operand path (f32 accumulation / epilogue),
    # validated against the f32 reference with a bf16-appropriate tolerance.
    out_bf16 = jax.block_until_ready(basic_block_ap(x, w1, bn1, w2, bn2))
    errbf = float(jnp.max(jnp.abs(out_bf16 - ref)))
    assert jnp.allclose(out_bf16, ref, rtol=5e-2, atol=1.5e-1), errbf

    print("KERNEL_OK")
</pallas_src>

<mosaic_0001>
module attributes {stable_mosaic.version = 11 : i64} {
  func.func @_basic_block_kernel(%arg0: i32, %arg1: memref<32x128xf32, #tpu.memory_space<vmem>>, %arg2: memref<432x128xf32, #tpu.memory_space<vmem>>, %arg3: memref<432x128xf32, #tpu.memory_space<vmem>>, %arg4: memref<2x128xf32, #tpu.memory_space<vmem>>, %arg5: memref<32x128xf32, #tpu.memory_space<vmem>>, %arg6: memref<36x144xf32, #tpu.memory_space<vmem>>) attributes {dimension_semantics = [#tpu.dimension_semantics<parallel>], iteration_bounds = array<i64: 2>, scalar_prefetch = 0 : i64, scratch_operands = 1 : i64, tpu.core_type = #tpu.core_type<tc>, window_params = [{transform_indices = @transform_0, window_bounds = array<i64: 32, 128>}, {pipeline_mode = #tpu.pipeline_mode<synchronous>, transform_indices = @transform_1, window_bounds = array<i64: 432, 128>}, {pipeline_mode = #tpu.pipeline_mode<synchronous>, transform_indices = @transform_2, window_bounds = array<i64: 432, 128>}, {pipeline_mode = #tpu.pipeline_mode<synchronous>, transform_indices = @transform_3, window_bounds = array<i64: 2, 128>}, {transform_indices = @transform_4, window_bounds = array<i64: 32, 128>}]} {
    %cst = arith.constant 0.000000e+00 : f32
    %0 = vector.broadcast %cst : f32 to vector<2x144xf32>
    %c0 = arith.constant 0 : index
    %c0_0 = arith.constant 0 : index
    %1 = vector.load %arg6[%c0, %c0_0] : memref<36x144xf32, #tpu.memory_space<vmem>>, vector<2x144xf32>
    tpu.vector_store %arg6[%c0, %c0_0], %0 {strides = array<i32>} : memref<36x144xf32, #tpu.memory_space<vmem>>, vector<2x144xf32>,
    %cst_1 = arith.constant 0.000000e+00 : f32
    %2 = vector.broadcast %cst_1 : f32 to vector<2x144xf32>
    %c34 = arith.constant 34 : index
    %c0_2 = arith.constant 0 : index
    %3 = vector.load %arg6[%c34, %c0_2] : memref<36x144xf32, #tpu.memory_space<vmem>>, vector<2x144xf32>
    tpu.vector_store %arg6[%c34, %c0_2], %2 {strides = array<i32>} : memref<36x144xf32, #tpu.memory_space<vmem>>, vector<2x144xf32>,
    %cst_3 = arith.constant 0.000000e+00 : f32
    %4 = vector.broadcast %cst_3 : f32 to vector<36x8xf32>
    %c0_4 = arith.constant 0 : index
    %c0_5 = arith.constant 0 : index
    %5 = vector.load %arg6[%c0_4, %c0_5] : memref<36x144xf32, #tpu.memory_space<vmem>>, vector<36x8xf32>
    tpu.vector_store %arg6[%c0_4, %c0_5], %4 {strides = array<i32>} : memref<36x144xf32, #tpu.memory_space<vmem>>, vector<36x8xf32>,
    %cst_6 = arith.constant 0.000000e+00 : f32
    %6 = vector.broadcast %cst_6 : f32 to vector<36x8xf32>
    %c0_7 = arith.constant 0 : index
    %c136 = arith.constant 136 : index
    %7 = vector.load %arg6[%c0_7, %c136] : memref<36x144xf32, #tpu.memory_space<vmem>>, vector<36x8xf32>
    tpu.vector_store %arg6[%c0_7, %c136], %6 {strides = array<i32>} : memref<36x144xf32, #tpu.memory_space<vmem>>, vector<36x8xf32>,
    %c0_8 = arith.constant 0 : index
    %c0_9 = arith.constant 0 : index
    %8 = vector.load %arg1[%c0_8, %c0_9] : memref<32x128xf32, #tpu.memory_space<vmem>>, vector<32x128xf32>
    %c2 = arith.constant 2 : index
    %c8 = arith.constant 8 : index
    %9 = vector.load %arg6[%c2, %c8] : memref<36x144xf32, #tpu.memory_space<vmem>>, vector<32x128xf32>
    tpu.vector_store %arg6[%c2, %c8], %8 {strides = array<i32>} : memref<36x144xf32, #tpu.memory_space<vmem>>, vector<32x128xf32>,
    %cst_10 = arith.constant 0.000000e+00 : f32
    %10 = vector.broadcast %cst_10 : f32 to vector<32x128xf32>
    %c0_11 = arith.constant 0 : index
    %c0_12 = arith.constant 0 : index
    %11 = vector.load %arg6[%c0_11, %c0_12] : memref<36x144xf32, #tpu.memory_space<vmem>>, vector<32x144xf32>
    %c0_13 = arith.constant 0 : index
    %c0_14 = arith.constant 0 : index
    %12 = vector.load %arg2[%c0_13, %c0_14] : memref<432x128xf32, #tpu.memory_space<vmem>>, vector<144x128xf32>
    %cst_15 = arith.constant dense<0.000000e+00> : vector<32x128xf32>
    %13 = tpu.matmul %11, %12, %cst_15 {dimension_numbers = #tpu.dot_dimension_numbers<[1], [0], [0], [1], [0, 0, 1, 1], [], []>} : vector<32x144xf32>, vector<144x128xf32>, vector<32x128xf32> -> vector<32x128xf32>
    %14 = arith.addf %10, %13 : vector<32x128xf32>
    %c2_16 = arith.constant 2 : index
    %c0_17 = arith.constant 0 : index
    %15 = vector.load %arg6[%c2_16, %c0_17] : memref<36x144xf32, #tpu.memory_space<vmem>>, vector<32x144xf32>
    %c144 = arith.constant 144 : index
    %c0_18 = arith.constant 0 : index
    %16 = vector.load %arg2[%c144, %c0_18] : memref<432x128xf32, #tpu.memory_space<vmem>>, vector<144x128xf32>
    %cst_19 = arith.constant dense<0.000000e+00> : vector<32x128xf32>
    %17 = tpu.matmul %15, %16, %cst_19 {dimension_numbers = #tpu.dot_dimension_numbers<[1], [0], [0], [1], [0, 0, 1, 1], [], []>} : vector<32x144xf32>, vector<144x128xf32>, vector<32x128xf32> -> vector<32x128xf32>
    %18 = arith.addf %14, %17 : vector<32x128xf32>
    %c4 = arith.constant 4 : index
    %c0_20 = arith.constant 0 : index
    %19 = vector.load %arg6[%c4, %c0_20] : memref<36x144xf32, #tpu.memory_space<vmem>>, vector<32x144xf32>
    %c288 = arith.constant 288 : index
    %c0_21 = arith.constant 0 : index
    %20 = vector.load %arg2[%c288, %c0_21] : memref<432x128xf32, #tpu.memory_space<vmem>>, vector<144x128xf32>
    %cst_22 = arith.constant dense<0.000000e+00> : vector<32x128xf32>
    %21 = tpu.matmul %19, %20, %cst_22 {dimension_numbers = #tpu.dot_dimension_numbers<[1], [0], [0], [1], [0, 0, 1, 1], [], []>} : vector<32x144xf32>, vector<144x128xf32>, vector<32x128xf32> -> vector<32x128xf32>
    %22 = arith.addf %18, %21 : vector<32x128xf32>
    %c0_23 = arith.constant 0 : index
    %c0_24 = arith.constant 0 : index
    %23 = vector.load %arg4[%c0_23, %c0_24] : memref<2x128xf32, #tpu.memory_space<vmem>>, vector<1x128xf32>
    %24 = vector.broadcast %23 : vector<1x128xf32> to vector<32x128xf32>
    %25 = arith.addf %22, %24 : vector<32x128xf32>
    %cst_25 = arith.constant 0.000000e+00 : f32
    %26 = vector.broadcast %cst_25 : f32 to vector<32x128xf32>
    %27 = arith.maximumf %25, %26 : vector<32x128xf32>
    %c2_26 = arith.constant 2 : index
    %c8_27 = arith.constant 8 : index
    %28 = vector.load %arg6[%c2_26, %c8_27] : memref<36x144xf32, #tpu.memory_space<vmem>>, vector<32x128xf32>
    tpu.vector_store %arg6[%c2_26, %c8_27], %27 {strides = array<i32>} : memref<36x144xf32, #tpu.memory_space<vmem>>, vector<32x128xf32>,
    %cst_28 = arith.constant 0.000000e+00 : f32
    %29 = vector.broadcast %cst_28 : f32 to vector<32x128xf32>
    %c0_29 = arith.constant 0 : index
    %c0_30 = arith.constant 0 : index
    %30 = vector.load %arg6[%c0_29, %c0_30] : memref<36x144xf32, #tpu.memory_space<vmem>>, vector<32x144xf32>
    %c0_31 = arith.constant 0 : index
    %c0_32 = arith.constant 0 : index
    %31 = vector.load %arg3[%c0_31, %c0_32] : memref<432x128xf32, #tpu.memory_space<vmem>>, vector<144x128xf32>
    %cst_33 = arith.constant dense<0.000000e+00> : vector<32x128xf32>
    %32 = tpu.matmul %30, %31, %cst_33 {dimension_numbers = #tpu.dot_dimension_numbers<[1], [0], [0], [1], [0, 0, 1, 1], [], []>} : vector<32x144xf32>, vector<144x128xf32>, vector<32x128xf32> -> vector<32x128xf32>
    %33 = arith.addf %29, %32 : vector<32x128xf32>
    %c2_34 = arith.constant 2 : index
    %c0_35 = arith.constant 0 : index
    %34 = vector.load %arg6[%c2_34, %c0_35] : memref<36x144xf32, #tpu.memory_space<vmem>>, vector<32x144xf32>
    %c144_36 = arith.constant 144 : index
    %c0_37 = arith.constant 0 : index
    %35 = vector.load %arg3[%c144_36, %c0_37] : memref<432x128xf32, #tpu.memory_space<vmem>>, vector<144x128xf32>
    %cst_38 = arith.constant dense<0.000000e+00> : vector<32x128xf32>
    %36 = tpu.matmul %34, %35, %cst_38 {dimension_numbers = #tpu.dot_dimension_numbers<[1], [0], [0], [1], [0, 0, 1, 1], [], []>} : vector<32x144xf32>, vector<144x128xf32>, vector<32x128xf32> -> vector<32x128xf32>
    %37 = arith.addf %33, %36 : vector<32x128xf32>
    %c4_39 = arith.constant 4 : index
    %c0_40 = arith.constant 0 : index
    %38 = vector.load %arg6[%c4_39, %c0_40] : memref<36x144xf32, #tpu.memory_space<vmem>>, vector<32x144xf32>
    %c288_41 = arith.constant 288 : index
    %c0_42 = arith.constant 0 : index
    %39 = vector.load %arg3[%c288_41, %c0_42] : memref<432x128xf32, #tpu.memory_space<vmem>>, vector<144x128xf32>
    %cst_43 = arith.constant dense<0.000000e+00> : vector<32x128xf32>
    %40 = tpu.matmul %38, %39, %cst_43 {dimension_numbers = #tpu.dot_dimension_numbers<[1], [0], [0], [1], [0, 0, 1, 1], [], []>} : vector<32x144xf32>, vector<144x128xf32>, vector<32x128xf32> -> vector<32x128xf32>
    %41 = arith.addf %37, %40 : vector<32x128xf32>
    %c1 = arith.constant 1 : index
    %c0_44 = arith.constant 0 : index
    %42 = vector.load %arg4[%c1, %c0_44] : memref<2x128xf32, #tpu.memory_space<vmem>>, vector<1x128xf32>
    %43 = vector.broadcast %42 : vector<1x128xf32> to vector<32x128xf32>
    %44 = arith.addf %41, %43 : vector<32x128xf32>
    %45 = arith.addf %44, %8 : vector<32x128xf32>
    %cst_45 = arith.constant 0.000000e+00 : f32
    %46 = vector.broadcast %cst_45 : f32 to vector<32x128xf32>
    %47 = arith.maximumf %45, %46 : vector<32x128xf32>
    %c0_46 = arith.constant 0 : index
    %c0_47 = arith.constant 0 : index
    %48 = vector.load %arg5[%c0_46, %c0_47] : memref<32x128xf32, #tpu.memory_space<vmem>>, vector<32x128xf32>
    tpu.vector_store %arg5[%c0_46, %c0_47], %47 {strides = array<i32>} : memref<32x128xf32, #tpu.memory_space<vmem>>, vector<32x128xf32>,
    return
  }
  func.func @transform_0(%arg0: i32) -> (i32, i32) {
    %c0_i32 = arith.constant 0 : i32
    %c0_i32_0 = arith.constant 0 : i32
    return %arg0, %c0_i32 : i32, i32
  }
  func.func @transform_1(%arg0: i32) -> (i32, i32) {
    %c0_i32 = arith.constant 0 : i32
    %c0_i32_0 = arith.constant 0 : i32
    %c0_i32_1 = arith.constant 0 : i32
    return %c0_i32, %c0_i32_0 : i32, i32
  }
  func.func @transform_2(%arg0: i32) -> (i32, i32) {
    %c0_i32 = arith.constant 0 : i32
    %c0_i32_0 = arith.constant 0 : i32
    %c0_i32_1 = arith.constant 0 : i32
    return %c0_i32, %c0_i32_0 : i32, i32
  }
  func.func @transform_3(%arg0: i32) -> (i32, i32) {
    %c0_i32 = arith.constant 0 : i32
    %c0_i32_0 = arith.constant 0 : i32
    %c0_i32_1 = arith.constant 0 : i32
    return %c0_i32, %c0_i32_0 : i32, i32
  }
  func.func @transform_4(%arg0: i32) -> (i32, i32) {
    %c0_i32 = arith.constant 0 : i32
    %c0_i32_0 = arith.constant 0 : i32
    return %arg0, %c0_i32 : i32, i32
  }
}

</mosaic_0001>

<bundles_post_ra>
// kernel: tile.13
= control target key start
LH: loop header
LB: loop body
LE: loop exit
PB: predicated region body
PF: predicated region fallthrough
CT: control target
= control target key end

     0   :  { %s28_s0 = inlined_call_operand.vmem [shape: f32[8], index: 0, kind: input, shape index: {}]   ;;  %s29_s1 = inlined_call_operand.vmem [shape: f32[16,8], index: 1, kind: output, shape index: {}]  }
   0x1   :  { %v4_v0 = vld [vmem:[%s28_s0] ss:$0 sm:$0xff] }
   0x2   :  { %5 = vst [vmem:[%s29_s1] sm:$0xff] %v4_v0  ;;  %8 = vst [vmem:[%s29_s1 + $0x8] sm:$0xff] %v4_v0 }

// kernel: tile.18
= control target key start
LH: loop header
LB: loop body
LE: loop exit
PB: predicated region body
PF: predicated region fallthrough
CT: control target
= control target key end

     0   :  { %s133_s10 = smov 120   ;;  %s134_s11 = smov 104   ;;  %vm3_vm0 = vcmask 64512   ;;  %vm9_vm1 = vcmask 1048512   ;;  %vm15_vm2 = vcmask 982912   ;;  %vm21_vm3 = vcmask 917312   ;;  %s209_s0 = inlined_call_operand.vmem [shape: f32[16,8], index: 0, kind: input, shape index: {}]   ;;  %s210_s1 = inlined_call_operand.vmem [shape: f32[1,128], index: 1, kind: output, shape index: {}]  }
   0x1   :  { %v103_v0 = vld [vmem:[%s209_s0 + $0xf] sm:$0x1]   ;;  %v105_v1 = vld [vmem:[%s209_s0 + $0xd] sm:$0x1]   ;;  %v104_v2 = vld [vmem:[%s209_s0 + $0xe] sm:$0x1]  }
   0x2   :  { %7 = vrot.lane.b32.xlu0 %v103_v0, %s133_s10  ;;  %19 = vrot.lane.b32.xlu1 %v105_v1, %s134_s11  ;;  %v106_v3 = vld [vmem:[%s209_s0 + $0xc] sm:$0x1]   ;;  %s135_s16 = smov 112   ;;  %s136_s17 = smov 96   ;;  %v107_v4 = vld [vmem:[%s209_s0 + $0xb] sm:$0x1]  }
   0x3   :  { %v108_v5 = vld [vmem:[%s209_s0 + $0xa] sm:$0x1]   ;;  %v2_v6 = vld [vmem:[%s209_s0] sm:$0x1]   ;;  %s137_s24 = smov 88   ;;  %s138_s25 = smov 80  }
   0x4   :  { %4 = vst.msk [vmem:[#allocation0] sm:$0x1] %vm3_vm0, %v2_v6   ;;  %v109_v7 = vld [vmem:[%s209_s0 + $0x9] sm:$0x1]   ;;  %v110_v8 = vld [vmem:[%s209_s0 + $0x8] sm:$0x1]  }
   0x5   :  { %s139_s30 = smov 72   ;;  %s140_s2 = smov 64   ;;  %v111_v9 = vld [vmem:[%s209_s0 + $0x7] sm:$0x1]   ;;  %v112_v10 = vld [vmem:[%s209_s0 + $0x6] sm:$0x1]  }
   0x6   :  { %13 = vrot.lane.b32.xlu0 %v104_v2, %s135_s16  ;;  %25 = vrot.lane.b32.xlu1 %v106_v3, %s136_s17  ;;  %s141_s7 = smov 56   ;;  %s142_s8 = smov 48   ;;  %v113_v11 = vld [vmem:[%s209_s0 + $0x5] sm:$0x1]   ;;  %v114_v12 = vld [vmem:[%s209_s0 + $0x4] sm:$0x1]  }
   0x7   :  { %s143_s13 = smov 40   ;;  %s144_s14 = smov 32   ;;  %v115_v13 = vld [vmem:[%s209_s0 + $0x3] sm:$0x1]   ;;  %v116_v14 = vld [vmem:[%s209_s0 + $0x2] sm:$0x1]  }
   0x8   :  { %s145_s19 = smov 24   ;;  %s146_s20 = smov 16   ;;  %v117_v15 = vld [vmem:[%s209_s0 + $0x1] sm:$0x1]   ;;  %vm27_vm4 = vcmask 851712   ;;  %vm33_vm5 = vcmask 786112  }
   0x9   :  { %s147_s0 = smov 8   ;;  %vm39_vm6 = vcmask 720512   ;;  %vm45_vm7 = vcmask 654912   ;;  %vm51_vm8 = vcmask 589312   ;;  %vm57_vm9 = vcmask 523712  }
   0xa   :  { %31 = vrot.lane.b32.xlu0 %v107_v4, %s137_s24  ;;  %37 = vrot.lane.b32.xlu1 %v108_v5, %s138_s25  ;;  %vm63_vm10 = vcmask 458112   ;;  %vm69_vm11 = vcmask 392512   ;;  %vm75_vm12 = vcmask 326912   ;;  %vm81_vm13 = vcmask 261312  }
   0xb   :  { %vm87_vm14 = vcmask 195712   ;;  %vm93_vm15 = vcmask 130112  }
   0xe   :  { %43 = vrot.lane.b32.xlu0 %v109_v7, %s139_s30  ;;  %49 = vrot.lane.b32.xlu1 %v110_v8, %s140_s2 }
  0x12   :  { %55 = vrot.lane.b32.xlu0 %v111_v9, %s141_s7  ;;  %61 = vrot.lane.b32.xlu1 %v112_v10, %s142_s8 }
  0x16   :  { %67 = vrot.lane.b32.xlu0 %v113_v11, %s143_s13  ;;  %73 = vrot.lane.b32.xlu1 %v114_v12, %s144_s14 }
  0x1a   :  { %79 = vrot.lane.b32.xlu0 %v115_v13, %s145_s19  ;;  %85 = vrot.lane.b32.xlu1 %v116_v14, %s146_s20 }
  0x1e   :  { %91 = vrot.lane.b32.xlu0 %v117_v15, %s147_s0 }
  0x74   :  { %v8_v16 = vpop.permute.xlu0 %7   ;;  %v20_v17 = vpop.permute.xlu1 %19  }
  0x75   :  { %10 = vst.msk [vmem:[#allocation0] sm:$0x1] %vm9_vm1, %v8_v16  }
  0x78   :  { %v14_v18 = vpop.permute.xlu0 %13   ;;  %v26_v19 = vpop.permute.xlu1 %25  }
  0x79   :  { %16 = vst.msk [vmem:[#allocation0] sm:$0x1] %vm15_vm2, %v14_v18  }
  0x7a   :  { %22 = vst.msk [vmem:[#allocation0] sm:$0x1] %vm21_vm3, %v20_v17  }
  0x7b   :  { %28 = vst.msk [vmem:[#allocation0] sm:$0x1] %vm27_vm4, %v26_v19  }
  0x7c   :  { %v32_v20 = vpop.permute.xlu0 %31   ;;  %v38_v21 = vpop.permute.xlu1 %37  }
  0x7d   :  { %34 = vst.msk [vmem:[#allocation0] sm:$0x1] %vm33_vm5, %v32_v20  }
  0x7e   :  { %40 = vst.msk [vmem:[#allocation0] sm:$0x1] %vm39_vm6, %v38_v21  }
  0x80   :  { %v44_v22 = vpop.permute.xlu0 %43   ;;  %v50_v23 = vpop.permute.xlu1 %49  }
  0x81   :  { %46 = vst.msk [vmem:[#allocation0] sm:$0x1] %vm45_vm7, %v44_v22  }
  0x82   :  { %52 = vst.msk [vmem:[#allocation0] sm:$0x1] %vm51_vm8, %v50_v23  }
  0x84   :  { %v56_v24 = vpop.permute.xlu0 %55   ;;  %v62_v25 = vpop.permute.xlu1 %61  }
  0x85   :  { %58 = vst.msk [vmem:[#allocation0] sm:$0x1] %vm57_vm9, %v56_v24  }
  0x86   :  { %64 = vst.msk [vmem:[#allocation0] sm:$0x1] %vm63_vm10, %v62_v25  }
  0x88   :  { %v68_v26 = vpop.permute.xlu0 %67   ;;  %v74_v27 = vpop.permute.xlu1 %73  }
  0x89   :  { %70 = vst.msk [vmem:[#allocation0] sm:$0x1] %vm69_vm11, %v68_v26  }
  0x8a   :  { %76 = vst.msk [vmem:[#allocation0] sm:$0x1] %vm75_vm12, %v74_v27  }
  0x8c   :  { %v80_v28 = vpop.permute.xlu0 %79   ;;  %v86_v29 = vpop.permute.xlu1 %85  }
  0x8d   :  { %82 = vst.msk [vmem:[#allocation0] sm:$0x1] %vm81_vm13, %v80_v28  }
  0x8e   :  { %88 = vst.msk [vmem:[#allocation0] sm:$0x1] %vm87_vm14, %v86_v29  }
  0x90   :  { %v92_v30 = vpop.permute.xlu0 %91  }
  0x91   :  { %94 = vst.msk [vmem:[#allocation0] sm:$0x1] %vm93_vm15, %v92_v30  }
  0x98   :  { %v99_v31 = vld [vmem:[#allocation0] sm:$0x1] }
  0x99   :  { %102 = vst [vmem:[%s210_s1] sm:$0x1] %v99_v31 }

// kernel: basic_block_ap.1
= control target key start
LH: loop header
LB: loop body
LE: loop exit
PB: predicated region body
PF: predicated region fallthrough
CT: control target
= control target key end

     0   :  { %s1306_s15 = smov 0   ;;  %s1949_s0 = inlined_call_operand.vmem [shape: f32[64,128], index: 0, kind: input, shape index: {}]   ;;  %s1950_s1 = inlined_call_operand.vmem [shape: f32[432,128], index: 1, kind: input, shape index: {}]   ;;  %s1951_s2 = inlined_call_operand.vmem [shape: f32[432,128], index: 2, kind: input, shape index: {}]   ;;  %s1952_s3 = inlined_call_operand.vmem [shape: f32[2,128], index: 3, kind: input, shape index: {}]   ;;  %s1953_s4 = inlined_call_operand.vmem [shape: f32[64,128], index: 4, kind: output, shape index: {}]  }
   0x1 LB: > { %s1220_s16 = sadd.s32 4294967295, %s1277_s15   ;;  %p1224_p0 = scmp.ge.s32.totalorder %s1277_s15, 1  ;;  %s1277_s15 = sphi %s1306_s15, %s14_s15  }
   0x2   : > { %p163_p1 = scmp.lt.s32.totalorder %s1277_s15, 3 }
   0x4   : > { %p164_p2 = pnand %p1224_p0, %p163_p1 }
   0x5   : > { %s1225_s17 = sshll.u32 (!%p164_p2), %s1220_s16, 2  ;;  %s1280_s20 = smov (!%p164_p2), 8  }
   0x6   : > { %167 = sbr.rel (%p164_p2) target bundleno = 773 (0x305), region = 36  ;;  %p190_p3 = scmp.lt.s32.totalorder (!%p164_p2), %s1225_s17, 7 }
   0xb   : > { %v290_v0 = vld [vmem:[%s1950_s1 + $0x78] sm:$0xff]  ;;  %v1279_v1 = vmov 0.0   ;;  %v289_v2 = vld [vmem:[%s1950_s1 + $0x70] sm:$0xff]  ;;  %v312_v3 = vld [vmem:[%s1950_s1 + $0x108] sm:$0xff]  ;;  %vm202_vm0 = vcmask 123904   ;;  %vm207_vm1 = vcmask 64512  }
   0xc   : > { %451 = vmatprep.subr.mxu1 %v1279_v1  ;;  %201 = vst [vmem:[#allocation2] sm:$0x3] %v1279_v1  ;;  %204 = vst [vmem:[#allocation2 + $0x40] sm:$0xc] %v1279_v1  ;;  %357 = vmatprep.subr.mxu0 %v1279_v1  ;;  %v311_v4 = vld [vmem:[%s1950_s1 + $0x100] sm:$0xff]  ;;  %vm214_vm2 = vcmask 130112  }
   0xd   : > { %452 = vmatpush1.msra.mxu1 %v290_v0  ;;  %358 = vmatpush1.msra.mxu0 %v312_v3  ;;  %203 = vst.msk [vmem:[#allocation2 + $0x8] sm:$0x3] %vm202_vm0, %v1279_v1  ;;  %s1955_s17 = smov (!%p190_p3, %s1225_s17), 7  ;;  %v288_v5 = vld [vmem:[%s1950_s1 + $0x68] sm:$0xff]  ;;  %v310_v6 = vld [vmem:[%s1950_s1 + $0xf8] sm:$0xff]  ;;  %v287_v7 = vld [vmem:[%s1950_s1 + $0x60] sm:$0xff] }
   0xe   : > { %208 = vst.msk [vmem:[#allocation2] sm:$0xff] %vm207_vm1, %v1279_v1  ;;  %209 = vst.msk [vmem:[#allocation2 + $0x10] sm:$0xff] %vm207_vm1, %v1279_v1  ;;  %453 = vmatprep.subr.mxu1 %v1279_v1  ;;  %359 = vmatprep.subr.mxu0 %v1279_v1  ;;  %s1226_s30 = sshll.u32 %s1955_s17, 3  ;;  %v309_v8 = vld [vmem:[%s1950_s1 + $0xf0] sm:$0xff]  ;;  %v286_v9 = vld [vmem:[%s1950_s1 + $0x58] sm:$0xff]  ;;  %vm229_vm3 = vcmask 1041408  }
   0xf   : > { %210 = vst.msk [vmem:[#allocation2 + $0x20] sm:$0xff] %vm207_vm1, %v1279_v1  ;;  %211 = vst.msk [vmem:[#allocation2 + $0x30] sm:$0xff] %vm207_vm1, %v1279_v1  ;;  %454 = vmatpush1.msra.mxu1 %v289_v2  ;;  %360 = vmatpush1.msra.mxu0 %v311_v4  ;;  %s1368_s11 = scalar_lea.vmem %s1949_s0, %s1226_s30  ;;  %v285_v18 = vld [vmem:[%s1950_s1 + $0x50] sm:$0xff]  ;;  %v308_v19 = vld [vmem:[%s1950_s1 + $0xe8] sm:$0xff]  ;;  %vm205_vm4 = vcmask 125954   ;;  %vm219_vm5 = vcmask 126016   ;;  %s199_s5 = scalar_lea.vmem %s1953_s4, %s1226_s30 }
  0x10   : > { %215 = vst.msk [vmem:[#allocation2 + $0x8] sm:$0xff] %vm214_vm2, %v1279_v1  ;;  %216 = vst.msk [vmem:[#allocation2 + $0x18] sm:$0xff] %vm214_vm2, %v1279_v1  ;;  %455 = vmatprep.subr.mxu1 %v1279_v1  ;;  %361 = vmatprep.subr.mxu0 %v1279_v1  ;;  %v221_v10 = vld [vmem:[%s1368_s11] sm:$0xff]  ;;  %v222_v11 = vld [vmem:[%s1368_s11 + $0x8] sm:$0xff]  ;;  %vm212_vm6 = vcmask 60416   ;;  %vm252_vm7 = vcmask 1047618  }
  0x11   : > { %217 = vst.msk [vmem:[#allocation2 + $0x28] sm:$0xff] %vm214_vm2, %v1279_v1  ;;  %218 = vst.msk [vmem:[#allocation2 + $0x38] sm:$0xff] %vm214_vm2, %v1279_v1  ;;  %456 = vmatpush1.msra.mxu1 %v288_v5  ;;  %362 = vmatpush1.msra.mxu0 %v310_v6  ;;  %v223_v12 = vld [vmem:[%s1368_s11 + $0x10] sm:$0xff]  ;;  %v230_v13 = vrot.slane %v221_v10, 6  ;;  %v231_v14 = vrot.slane %v222_v11, 6  ;;  %v224_v16 = vld [vmem:[%s1368_s11 + $0x18] sm:$0xff] }
  0x12   : > { %457 = vmatprep.subr.mxu1 %v1279_v1  ;;  %363 = vmatprep.subr.mxu0 %v1279_v1  ;;  %v233_v15 = vrot.slane %v223_v12, 6  ;;  %v235_v17 = vrot.slane %v224_v16, 6  ;;  %v284_v22 = vld [vmem:[%s1950_s1 + $0x48] sm:$0xff]  ;;  %206 = vst.msk [vmem:[#allocation2 + $0x48] sm:$0xc] %vm205_vm4, %v1279_v1  ;;  %v283_v24 = vld [vmem:[%s1950_s1 + $0x40] sm:$0xff] }
  0x13   : > { %458 = vmatpush1.msra.mxu1 %v287_v7  ;;  %364 = vmatpush1.msra.mxu0 %v309_v8  ;;  %v232_v21 = vsel %vm229_vm3, %v230_v13, %v231_v14  ;;  %220 = vst.msk [vmem:[#allocation2 + $0x48] sm:$0xf] %vm219_vm5, %v1279_v1  ;;  %v307_v25 = vld [vmem:[%s1950_s1 + $0xe0] sm:$0xff]  ;;  %v282_v26 = vld [vmem:[%s1950_s1 + $0x38] sm:$0xff]  ;;  %v281_v28 = vld [vmem:[%s1950_s1 + $0x30] sm:$0xff]  ;;  %vm254_vm8 = vcmask 64514  }
  0x14   : > { %459 = vmatprep.subr.mxu1 %v1279_v1  ;;  %365 = vmatprep.subr.mxu0 %v1279_v1  ;;  %v234_v20 = vsel %vm229_vm3, %v231_v14, %v233_v15  ;;  %v236_v23 = vsel %vm229_vm3, %v233_v15, %v235_v17  ;;  %213 = vst.msk [vmem:[#allocation2 + $0x40] sm:$0xf] %vm212_vm6, %v1279_v1  ;;  %v306_v27 = vld [vmem:[%s1950_s1 + $0xd8] sm:$0xff]  ;;  %v305_v29 = vld [vmem:[%s1950_s1 + $0xd0] sm:$0xff]  ;;  %v280_v30 = vld [vmem:[%s1950_s1 + $0x28] sm:$0xff]  ;;  %vm256_vm9 = vcmask 1047616  }
  0x15   : > { %237 = vrot.lane.b32.xlu0 %v230_v13, %s1280_s20  ;;  %460 = vmatpush1.msra.mxu1 %v286_v9  ;;  %v304_v31 = vld [vmem:[%s1950_s1 + $0xc8] sm:$0xff]  ;;  %v279_v32 = vld [vmem:[%s1950_s1 + $0x20] sm:$0xff]  ;;  %v278_v34 = vld [vmem:[%s1950_s1 + $0x18] sm:$0xff]  ;;  %vm348_vm10 = vcmask 130048   ;;  %vm263_vm11 = vcmask 1041472   ;;  %vm265_vm12 = vcmask 58368  }
  0x16   : > { %241 = vrot.lane.b32.xlu1 %v234_v20, %s1280_s20  ;;  %461 = vmatprep.subr.mxu1 %v1279_v1  ;;  %v303_v33 = vld [vmem:[%s1950_s1 + $0xc0] sm:$0xff]  ;;  %v302_v35 = vld [vmem:[%s1950_s1 + $0xb8] sm:$0xff]  ;;  %v277_v36 = vld [vmem:[%s1950_s1 + $0x10] sm:$0xff]  ;;  %vm325_vm13 = vcmask 1045504   ;;  %vm562_vm14 = vcmask 1043456  }
  0x17   : > { %462 = vmatpush1.msra.mxu1 %v285_v18  ;;  %366 = vmatpush1.msra.mxu0 %v308_v19  ;;  %v301_v37 = vld [vmem:[%s1950_s1 + $0xb0] sm:$0xff]  ;;  %v276_v38 = vld [vmem:[%s1950_s1 + $0x8] sm:$0xff]  ;;  %v275_v40 = vld [vmem:[%s1950_s1] sm:$0xff] }
  0x18   : > { %463 = vmatprep.subr.mxu1 %v1279_v1  ;;  %367 = vmatprep.subr.mxu0 %v1279_v1  ;;  %v300_v39 = vld [vmem:[%s1950_s1 + $0xa8] sm:$0xff]  ;;  %v299_v41 = vld [vmem:[%s1950_s1 + $0xa0] sm:$0xff]  ;;  %v298_v43 = vld [vmem:[%s1950_s1 + $0x98] sm:$0xff] }
  0x19   : > { %239 = vrot.lane.b32.xlu0 %v232_v21, %s1280_s20  ;;  %464 = vmatpush1.msra.mxu1 %v284_v22  ;;  %v292_v42 = vld [vmem:[%s1950_s1 + $0x88] sm:$0xff]  ;;  %v291_v44 = vld [vmem:[%s1950_s1 + $0x80] sm:$0xff]  ;;  %v297_v45 = vld [vmem:[%s1950_s1 + $0x90] sm:$0xff] }
  0x1a   : > { %243 = vrot.lane.b32.xlu1 %v236_v23, %s1280_s20  ;;  %465 = vmatprep.subr.mxu1 %v1279_v1  ;;  %v314_v46 = vld [vmem:[%s1950_s1 + $0x118] sm:$0xff]  ;;  %v313_v47 = vld [vmem:[%s1950_s1 + $0x110] sm:$0xff]  ;;  %v553_v14 = vld [vmem:[%s1950_s1 + $0x188] sm:$0xff] }
  0x1b   : > { %466 = vmatpush1.msra.mxu1 %v283_v24  ;;  %368 = vmatpush1.msra.mxu0 %v307_v25  ;;  %v555_v6 = vld [vmem:[%s1950_s1 + $0x198] sm:$0xff]  ;;  %v554_v12 = vld [vmem:[%s1950_s1 + $0x190] sm:$0xff]  ;;  %v552_v19 = vld [vmem:[%s1950_s1 + $0x180] sm:$0xff] }
  0x1c   : > { %467 = vmatprep.subr.mxu1 %v1279_v1  ;;  %369 = vmatprep.subr.mxu0 %v1279_v1  ;;  %v551_v22 = vld [vmem:[%s1950_s1 + $0x178] sm:$0xff] }
  0x1d   : > { %245 = vrot.lane.b32.xlu0 %v235_v17, %s1280_s20  ;;  %468 = vmatpush1.msra.mxu1 %v282_v26  ;;  %v550_v26 = vld [vmem:[%s1950_s1 + $0x170] sm:$0xff] }
  0x1e   : > { %469 = vmatprep.subr.mxu1 %v1279_v1  ;;  %370 = vmatpush1.msra.mxu0 %v306_v27 }
  0x1f   : > { %470 = vmatpush1.msra.mxu1 %v281_v28  ;;  %371 = vmatprep.subr.mxu0 %v1279_v1  ;;  %v549_v28 = vld [vmem:[%s1950_s1 + $0x168] sm:$0xff] }
  0x20   : > { %471 = vmatprep.subr.mxu1 %v1279_v1  ;;  %372 = vmatpush1.msra.mxu0 %v305_v29 }
  0x21   : > { %472 = vmatpush1.msra.mxu1 %v280_v30  ;;  %373 = vmatprep.subr.mxu0 %v1279_v1 }
  0x22   : > { %473 = vmatprep.subr.mxu1 %v1279_v1  ;;  %374 = vmatpush1.msra.mxu0 %v304_v31  ;;  %v548_v31 = vld [vmem:[%s1950_s1 + $0x160] sm:$0xff] }
  0x23   : > { %474 = vmatpush1.msra.mxu1 %v279_v32  ;;  %375 = vmatprep.subr.mxu0 %v1279_v1  ;;  %v547_v32 = vld [vmem:[%s1950_s1 + $0x158] sm:$0xff] }
  0x24   : > { %475 = vmatprep.subr.mxu1 %v1279_v1  ;;  %376 = vmatpush1.msra.mxu0 %v303_v33  ;;  %v546_v33 = vld [vmem:[%s1950_s1 + $0x150] sm:$0xff] }
  0x25   : > { %476 = vmatpush1.msra.mxu1 %v278_v34  ;;  %377 = vmatprep.subr.mxu0 %v1279_v1  ;;  %v545_v34 = vld [vmem:[%s1950_s1 + $0x148] sm:$0xff] }
  0x26   : > { %477 = vmatprep.subr.mxu1 %v1279_v1  ;;  %378 = vmatpush1.msra.mxu0 %v302_v35  ;;  %v544_v35 = vld [vmem:[%s1950_s1 + $0x140] sm:$0xff] }
  0x27   : > { %478 = vmatpush1.msra.mxu1 %v277_v36  ;;  %379 = vmatprep.subr.mxu0 %v1279_v1  ;;  %v543_v36 = vld [vmem:[%s1950_s1 + $0x138] sm:$0xff] }
  0x28   : > { %479 = vmatprep.subr.mxu1 %v1279_v1  ;;  %380 = vmatpush1.msra.mxu0 %v301_v37  ;;  %v542_v37 = vld [vmem:[%s1950_s1 + $0x130] sm:$0xff] }
  0x29   : > { %480 = vmatpush1.msra.mxu1 %v276_v38  ;;  %381 = vmatprep.subr.mxu0 %v1279_v1  ;;  %v541_v38 = vld [vmem:[%s1950_s1 + $0x128] sm:$0xff] }
  0x2a   : > { %481 = vmatprep.subr.mxu1 %v1279_v1  ;;  %382 = vmatpush1.msra.mxu0 %v300_v39  ;;  %v540_v39 = vld [vmem:[%s1950_s1 + $0x120] sm:$0xff] }
  0x2b   : > { %482 = vmatpush1.msra.mxu1 %v275_v40  ;;  %383 = vmatprep.subr.mxu0 %v1279_v1  ;;  %v557_v40 = vld [vmem:[%s1950_s1 + $0x1a8] sm:$0xff] }
  0x2c   : > { %511 = vmatprep.subr.mxu1 %v1279_v1  ;;  %384 = vmatpush1.msra.mxu0 %v299_v41 }
  0x2d   : > { %512 = vmatpush2.msra.mxu1 %v292_v42  ;;  %385 = vmatprep.subr.mxu0 %v1279_v1 }
  0x2e   : > { %513 = vmatprep.subr.mxu1 %v1279_v1  ;;  %386 = vmatpush1.msra.mxu0 %v298_v43  ;;  %v556_v43 = vld [vmem:[%s1950_s1 + $0x1a0] sm:$0xff] }
  0x2f   : > { %514 = vmatpush2.msra.mxu1 %v291_v44  ;;  %387 = vmatprep.subr.mxu0 %v1279_v1 }
  0x30   : > { %388 = vmatpush1.msra.mxu0 %v297_v45  ;;  %819 = vmatprep.subr.mxu1 %v1279_v1 }
  0x31   : > { %417 = vmatprep.subr.mxu0 %v1279_v1 }
  0x32   : > { %418 = vmatpush2.msra.mxu0 %v314_v46 }
  0x33   : > { %419 = vmatprep.subr.mxu0 %v1279_v1 }
  0x34   : > { %420 = vmatpush2.msra.mxu0 %v313_v47 }
  0x35   : > { %593 = vmatprep.subr.mxu0 %v1279_v1 }
  0x87   : > { %v238_v48 = vpop.permute.xlu0 %237 }
  0x88   : > { %253 = vst.msk [vmem:[#allocation2] sm:$0xfc] %vm252_vm7, %v238_v48  ;;  %v242_v49 = vpop.permute.xlu1 %241 }
  0x89   : > { %255 = vst.msk [vmem:[#allocation2 + $0x8] sm:$0xfc] %vm254_vm8, %v238_v48 }
  0x8a   : > { %259 = vst.msk [vmem:[#allocation2 + $0x20] sm:$0xff] %vm256_vm9, %v242_v49 }
  0x8b   : > { %260 = vst.msk [vmem:[#allocation2 + $0x28] sm:$0xff] %vm207_vm1, %v242_v49  ;;  %v240_v50 = vpop.permute.xlu0 %239 }
  0x8c   : > { %257 = vst.msk [vmem:[#allocation2 + $0x10] sm:$0xff] %vm256_vm9, %v240_v50  ;;  %v244_v51 = vpop.permute.xlu1 %243 }
  0x8d   : > { %258 = vst.msk [vmem:[#allocation2 + $0x18] sm:$0xff] %vm207_vm1, %v240_v50  ;;  %262 = vst.msk [vmem:[#allocation2 + $0x38] sm:$0xff] %vm207_vm1, %v244_v51 }
  0x8e   : > { %261 = vst.msk [vmem:[#allocation2 + $0x30] sm:$0xff] %vm256_vm9, %v244_v51 }
  0x8f   : > { %v267_v53 = vld [vmem:[#allocation2] sm:$0xff]  ;;  %v246_v54 = vpop.permute.xlu0 %245 }
  0x90   : > { %v268_v52 = vld [vmem:[#allocation2 + $0x8] sm:$0xff]  ;;  %264 = vst.msk [vmem:[#allocation2 + $0x40] sm:$0x3] %vm263_vm11, %v246_v54  ;;  %v293_v56 = vld [vmem:[#allocation2] sm:$0xfc] }
  0x91   : > { %1233 = vmatprep.mubr.msk.f32.mxu1 %vm348_vm10, %v268_v52  ;;  %v294_v55 = vld [vmem:[#allocation2 + $0x8] sm:$0xfc]  ;;  %266 = vst.msk [vmem:[#allocation2 + $0x48] sm:$0x3] %vm265_vm12, %v246_v54  ;;  %v326_v62 = vrot.slane %v293_v56, 2  ;;  %v1523_v2 = vld [vmem:[#allocation2 + $0x20] sm:$0xff] }
  0x92   : > { %516 = vmatmul.mubr.f32.vlgmr.msra.gmra.mxu1 %v267_v53  ;;  %v1512_v57 = vld [vmem:[#allocation2 + $0x28] sm:$0xff]  ;;  %v329_v60 = vrot.slane %v294_v55, 2  ;;  %v332_v9 = vrot.slane %v1523_v2, 2  ;;  %v536_v41 = vld [vmem:[#allocation2] sm:$0xf0]  ;;  %v569_v47 = vrot.slane %v1523_v2, 4 }
  0x93   : > { %v1516_v59 = vld [vmem:[#allocation2 + $0x10] sm:$0xff]  ;;  %v334_v0 = vrot.slane %v1512_v57, 2  ;;  %v537_v24 = vld [vmem:[#allocation2 + $0x8] sm:$0xf0]  ;;  %v571_v44 = vrot.slane %v1512_v57, 4  ;;  %v563_v45 = vrot.slane %v536_v41, 4 }
  0x94   : > { %v1514_v58 = vld [vmem:[#allocation2 + $0x18] sm:$0xff]  ;;  %v327_v63 = vrot.slane %v1516_v59, 2  ;;  %v566_v29 = vrot.slane %v537_v24, 4  ;;  %v564_v42 = vrot.slane %v1516_v59, 4 }
  0x95   : > { %1234 = vmatprep.mubr.msk.f32.mxu1 %vm348_vm10, %v1514_v58  ;;  %v330_v61 = vrot.slane %v1514_v58, 2  ;;  %v1525_v3 = vld [vmem:[#allocation2 + $0x38] sm:$0xff]  ;;  %v1534_v8 = vld [vmem:[#allocation2 + $0x30] sm:$0xff]  ;;  %v567_v25 = vrot.slane %v1514_v58, 4 }
  0x96   : > { %521 = vmatmul.mubr.f32.gmra.mxu1 %v1516_v59  ;;  %v328_v5 = vsel %vm325_vm13, %v326_v62, %v327_v63  ;;  %v338_v7 = vrot.slane %v1525_v3, 2  ;;  %v336_v13 = vrot.slane %v1534_v8, 2  ;;  %v333_v18 = vsel %vm325_vm13, %v327_v63, %v332_v9  ;;  %v776_v62 = vld [vmem:[%s1951_s2 + $0x108] sm:$0xff] }
  0x97   : > { %v331_v4 = vsel %vm325_vm13, %v329_v60, %v330_v61  ;;  %1235 = vmatprep.mubr.msk.f32.mxu1 %vm348_vm10, %v1512_v57  ;;  %v335_v11 = vsel %vm325_vm13, %v330_v61, %v334_v0  ;;  %v295_v17 = vld [vmem:[#allocation2 + $0x40] sm:$0x3]  ;;  %v568_v30 = vsel %vm562_vm14, %v566_v29, %v567_v25  ;;  %v565_v46 = vsel %vm562_vm14, %v563_v45, %v564_v42  ;;  %v754_v60 = vld [vmem:[%s1951_s2 + $0x78] sm:$0xff]  ;;  %v753_v61 = vld [vmem:[%s1951_s2 + $0x70] sm:$0xff] }
  0x98   : > { %1229 = vmatprep.mubr.msk.f32.mxu0 %vm348_vm10, %v331_v4  ;;  %v296_v10 = vld [vmem:[#allocation2 + $0x48] sm:$0x3]  ;;  %v339_v15 = vsel %vm325_vm13, %v334_v0, %v338_v7  ;;  %v337_v20 = vsel %vm325_vm13, %v332_v9, %v336_v13  ;;  %v340_v21 = vrot.slane %v295_v17, 2  ;;  %v572_v48 = vsel %vm562_vm14, %v567_v25, %v571_v44  ;;  %v538_v55 = vld [vmem:[#allocation2 + $0x40] sm:$0xf]  ;;  %820 = vmatpush1.msra.mxu1 %v776_v62  ;;  %v773_v4 = vld [vmem:[%s1951_s2 + $0xf0] sm:$0xff] }
  0x99   : > { %422 = vmatmul.mubr.f32.vlgmr.msra.gmra.mxu0 %v328_v5  ;;  %v342_v16 = vrot.slane %v296_v10, 2  ;;  %v575_v49 = vrot.slane %v1525_v3, 4  ;;  %v539_v50 = vld [vmem:[#allocation2 + $0x48] sm:$0xf]  ;;  %v570_v51 = vsel %vm562_vm14, %v564_v42, %v569_v47  ;;  %v573_v52 = vrot.slane %v1534_v8, 4  ;;  %v775_v0 = vld [vmem:[%s1951_s2 + $0x100] sm:$0xff]  ;;  %821 = vmatprep.subr.mxu1 %v1279_v1 }
  0x9a   : > { %594 = vmatpush1.msra.mxu0 %v555_v6  ;;  %1230 = vmatprep.mubr.msk.f32.mxu0 %vm348_vm10, %v335_v11  ;;  %v341_v27 = vsel %vm325_vm13, %v336_v13, %v340_v21  ;;  %v579_v54 = vrot.slane %v539_v50, 4  ;;  %v577_v57 = vrot.slane %v538_v55, 4  ;;  %v752_v63 = vld [vmem:[%s1951_s2 + $0x68] sm:$0xff]  ;;  %v750_v5 = vld [vmem:[%s1951_s2 + $0x58] sm:$0xff]  ;;  %v747_v11 = vld [vmem:[%s1951_s2 + $0x40] sm:$0xff] }
  0x9b   : > { %595 = vmatprep.subr.mxu0 %v1279_v1  ;;  %526 = vmatmul.mubr.f32.gmra.mxu1 %v1523_v2  ;;  %v343_v23 = vsel %vm325_vm13, %v338_v7, %v342_v16  ;;  %v576_v53 = vsel %vm562_vm14, %v571_v44, %v575_v49  ;;  %v574_v56 = vsel %vm562_vm14, %v569_v47, %v573_v52  ;;  %v774_v2 = vld [vmem:[%s1951_s2 + $0xf8] sm:$0xff]  ;;  %v772_v6 = vld [vmem:[%s1951_s2 + $0xe8] sm:$0xff]  ;;  %v749_v7 = vld [vmem:[%s1951_s2 + $0x50] sm:$0xff] }
  0x9c   : > { %596 = vmatpush1.msra.mxu0 %v554_v12  ;;  %1236 = vmatprep.mubr.msk.f32.mxu1 %vm348_vm10, %v1525_v3  ;;  %v580_v58 = vsel %vm562_vm14, %v575_v49, %v579_v54  ;;  %v578_v59 = vsel %vm562_vm14, %v573_v52, %v577_v57  ;;  %v751_v3 = vld [vmem:[%s1951_s2 + $0x60] sm:$0xff]  ;;  %v748_v9 = vld [vmem:[%s1951_s2 + $0x48] sm:$0xff]  ;;  %v770_v10 = vld [vmem:[%s1951_s2 + $0xd8] sm:$0xff] }
  0x9d   : > { %597 = vmatprep.subr.mxu0 %v1279_v1  ;;  %427 = vmatmul.mubr.f32.gmra.mxu0 %v333_v18  ;;  %v769_v12 = vld [vmem:[%s1951_s2 + $0xd0] sm:$0xff]  ;;  %v746_v13 = vld [vmem:[%s1951_s2 + $0x38] sm:$0xff]  ;;  %v767_v16 = vld [vmem:[%s1951_s2 + $0xc0] sm:$0xff] }
  0x9e   : > { %598 = vmatpush1.msra.mxu0 %v553_v14  ;;  %1231 = vmatprep.mubr.msk.f32.mxu0 %vm348_vm10, %v339_v15  ;;  %v768_v14 = vld [vmem:[%s1951_s2 + $0xc8] sm:$0xff]  ;;  %v745_v15 = vld [vmem:[%s1951_s2 + $0x30] sm:$0xff]  ;;  %v743_v18 = vld [vmem:[%s1951_s2 + $0x20] sm:$0xff] }
  0x9f   : > { %599 = vmatprep.subr.mxu0 %v1279_v1  ;;  %531 = vmatmul.mubr.f32.gmra.mxu1 %v1534_v8  ;;  %v771_v8 = vld [vmem:[%s1951_s2 + $0xe0] sm:$0xff]  ;;  %v744_v17 = vld [vmem:[%s1951_s2 + $0x28] sm:$0xff]  ;;  %v762_v55 = vld [vmem:[%s1951_s2 + $0x98] sm:$0xff] }
  0xa0   : > { %600 = vmatpush1.msra.mxu0 %v552_v19  ;;  %822 = vmatpush1.msra.mxu1 %v775_v0  ;;  %v742_v19 = vld [vmem:[%s1951_s2 + $0x18] sm:$0xff]  ;;  %v764_v45 = vld [vmem:[%s1951_s2 + $0xa8] sm:$0xff]  ;;  %v763_v47 = vld [vmem:[%s1951_s2 + $0xa0] sm:$0xff] }
  0xa1   : > { %601 = vmatprep.subr.mxu0 %v1279_v1  ;;  %432 = vmatmul.mubr.f32.gmra.mxu0 %v337_v20  ;;  %v755_v49 = vld [vmem:[%s1951_s2 + $0x80] sm:$0xff]  ;;  %v778_v0 = vld [vmem:[%s1951_s2 + $0x118] sm:$0xff] }
  0xa2   : > { %602 = vmatpush1.msra.mxu0 %v551_v22  ;;  %1232 = vmatprep.mubr.msk.f32.mxu0 %vm348_vm10, %v343_v23 }
  0xa3   : > { %603 = vmatprep.subr.mxu0 %v1279_v1  ;;  %823 = vmatprep.subr.mxu1 %v1279_v1 }
  0xa4   : > { %604 = vmatpush1.msra.mxu0 %v550_v26  ;;  %824 = vmatpush1.msra.mxu1 %v774_v2 }
  0xa5   : > { %605 = vmatprep.subr.mxu0 %v1279_v1  ;;  %437 = vmatmul.mubr.f32.gmra.mxu0 %v341_v27 }
  0xa6   : > { %606 = vmatpush1.msra.mxu0 %v549_v28  ;;  %1237 = vmatprep.mubr.msk.f32.mxu0 %vm348_vm10, %v568_v30 }
  0xa7   : > { %607 = vmatprep.subr.mxu0 %v1279_v1  ;;  %825 = vmatprep.subr.mxu1 %v1279_v1 }
  0xa8   : > { %608 = vmatpush1.msra.mxu0 %v548_v31  ;;  %826 = vmatpush1.msra.mxu1 %v773_v4 }
  0xa9   : > { %609 = vmatprep.subr.mxu0 %v1279_v1  ;;  %827 = vmatprep.subr.mxu1 %v1279_v1 }
  0xaa   : > { %610 = vmatpush1.msra.mxu0 %v547_v32  ;;  %828 = vmatpush1.msra.mxu1 %v772_v6 }
  0xab   : > { %611 = vmatprep.subr.mxu0 %v1279_v1  ;;  %829 = vmatprep.subr.mxu1 %v1279_v1 }
  0xac   : > { %612 = vmatpush1.msra.mxu0 %v546_v33  ;;  %830 = vmatpush1.msra.mxu1 %v771_v8 }
  0xad   : > { %613 = vmatprep.subr.mxu0 %v1279_v1  ;;  %831 = vmatprep.subr.mxu1 %v1279_v1 }
  0xae   : > { %614 = vmatpush1.msra.mxu0 %v545_v34  ;;  %832 = vmatpush1.msra.mxu1 %v770_v10 }
  0xaf   : > { %615 = vmatprep.subr.mxu0 %v1279_v1  ;;  %833 = vmatprep.subr.mxu1 %v1279_v1 }
  0xb0   : > { %616 = vmatpush1.msra.mxu0 %v544_v35  ;;  %834 = vmatpush1.msra.mxu1 %v769_v12 }
  0xb1   : > { %617 = vmatprep.subr.mxu0 %v1279_v1  ;;  %835 = vmatprep.subr.mxu1 %v1279_v1 }
  0xb2   : > { %618 = vmatpush1.msra.mxu0 %v543_v36  ;;  %836 = vmatpush1.msra.mxu1 %v768_v14  ;;  %v741_v36 = vld [vmem:[%s1951_s2 + $0x10] sm:$0xff] }
  0xb3   : > { %619 = vmatprep.subr.mxu0 %v1279_v1  ;;  %837 = vmatprep.subr.mxu1 %v1279_v1 }
  0xb4   : > { %620 = vmatpush1.msra.mxu0 %v542_v37  ;;  %838 = vmatpush1.msra.mxu1 %v767_v16  ;;  %v766_v37 = vld [vmem:[%s1951_s2 + $0xb8] sm:$0xff] }
  0xb5   : > { %621 = vmatprep.subr.mxu0 %v1279_v1  ;;  %839 = vmatprep.subr.mxu1 %v1279_v1 }
  0xb6   : > { %622 = vmatpush1.msra.mxu0 %v541_v38  ;;  %v740_v38 = vld [vmem:[%s1951_s2 + $0x8] sm:$0xff]  ;;  %840 = vmatpush1.msra.mxu1 %v766_v37 }
  0xb7   : > { %623 = vmatprep.subr.mxu0 %v1279_v1  ;;  %841 = vmatprep.subr.mxu1 %v1279_v1 }
  0xb8   : > { %624 = vmatpush1.msra.mxu0 %v540_v39  ;;  %v765_v39 = vld [vmem:[%s1951_s2 + $0xb0] sm:$0xff] }
  0xb9   : > { %653 = vmatprep.subr.mxu0 %v1279_v1  ;;  %842 = vmatpush1.msra.mxu1 %v765_v39 }
  0xba   : > { %654 = vmatpush2.msra.mxu0 %v557_v40  ;;  %v739_v40 = vld [vmem:[%s1951_s2] sm:$0xff]  ;;  %843 = vmatprep.subr.mxu1 %v1279_v1 }
  0xbb   : > { %655 = vmatprep.subr.mxu0 %v1279_v1  ;;  %844 = vmatpush1.msra.mxu1 %v764_v45 }
  0xbc   : > { %656 = vmatpush2.msra.mxu0 %v556_v43  ;;  %v1241_v43 = vld [vmem:[%s1952_s3] ss:$0 sm:$0xff]  ;;  %845 = vmatprep.subr.mxu1 %v1279_v1 }
  0xbd   : > { %658 = vmatmul.mubr.f32.vlgmr.msra.gmra.mxu0 %v565_v46  ;;  %913 = vmatprep.subr.mxu0 %v1279_v1  ;;  %v756_v46 = vld [vmem:[%s1951_s2 + $0x88] sm:$0xff] }
  0xbe   : > { %1238 = vmatprep.mubr.msk.f32.mxu0 %vm348_vm10, %v572_v48  ;;  %914 = vmatpush1.msra.mxu0 %v754_v60 }
  0xbf   : > { %915 = vmatprep.subr.mxu0 %v1279_v1  ;;  %846 = vmatpush1.msra.mxu1 %v763_v47 }
  0xc0   : > { %916 = vmatpush1.msra.mxu0 %v753_v61  ;;  %847 = vmatprep.subr.mxu1 %v1279_v1 }
  0xc1   : > { %663 = vmatmul.mubr.f32.gmra.mxu0 %v570_v51  ;;  %917 = vmatprep.subr.mxu0 %v1279_v1 }
  0xc2   : > { %1239 = vmatprep.mubr.msk.f32.mxu0 %vm348_vm10, %v576_v53  ;;  %918 = vmatpush1.msra.mxu0 %v752_v63 }
  0xc3   : > { %919 = vmatprep.subr.mxu0 %v1279_v1  ;;  %848 = vmatpush1.msra.mxu1 %v762_v55 }
  0xc4   : > { %920 = vmatpush1.msra.mxu0 %v751_v3  ;;  %849 = vmatprep.subr.mxu1 %v1279_v1  ;;  %v777_v3 = vld [vmem:[%s1951_s2 + $0x110] sm:$0xff] }
  0xc5   : > { %668 = vmatmul.mubr.f32.gmra.mxu0 %v574_v56  ;;  %921 = vmatprep.subr.mxu0 %v1279_v1  ;;  %v761_v56 = vld [vmem:[%s1951_s2 + $0x90] sm:$0xff] }
  0xc6   : > { %1240 = vmatprep.mubr.msk.f32.mxu0 %vm348_vm10, %v580_v58  ;;  %922 = vmatpush1.msra.mxu0 %v750_v5 }
  0xc7   : > { %923 = vmatprep.subr.mxu0 %v1279_v1  ;;  %850 = vmatpush1.msra.mxu1 %v761_v56 }
  0xc8   : > { %924 = vmatpush1.msra.mxu0 %v749_v7  ;;  %879 = vmatprep.subr.mxu1 %v1279_v1 }
  0xc9   : > { %673 = vmatmul.mubr.f32.gmra.mxu0 %v578_v59  ;;  %925 = vmatprep.subr.mxu0 %v1279_v1 }
  0xca   : > { %926 = vmatpush1.msra.mxu0 %v748_v9  ;;  %880 = vmatpush2.msra.mxu1 %v778_v0  ;;  %v1010_v0 = vld [vmem:[%s1951_s2 + $0x160] sm:$0xff] }
  0xcb   : > { %927 = vmatprep.subr.mxu0 %v1279_v1  ;;  %881 = vmatprep.subr.mxu1 %v1279_v1 }
  0xcc   : > { %928 = vmatpush1.msra.mxu0 %v747_v11  ;;  %882 = vmatpush2.msra.mxu1 %v777_v3  ;;  %v1008_v3 = vld [vmem:[%s1951_s2 + $0x150] sm:$0xff] }
  0xcd   : > { %929 = vmatprep.subr.mxu0 %v1279_v1  ;;  %1054 = vmatprep.subr.mxu1 %v1279_v1 }
  0xce   : > { %930 = vmatpush1.msra.mxu0 %v746_v13 }
  0xcf   : > { %931 = vmatprep.subr.mxu0 %v1279_v1 }
  0xd0   : > { %932 = vmatpush1.msra.mxu0 %v745_v15 }
  0xd1   : > { %933 = vmatprep.subr.mxu0 %v1279_v1 }
  0xd2   : > { %934 = vmatpush1.msra.mxu0 %v744_v17 }
  0xd3   : > { %935 = vmatprep.subr.mxu0 %v1279_v1 }
  0xd4   : > { %936 = vmatpush1.msra.mxu0 %v743_v18 }
  0xd5   : > { %937 = vmatprep.subr.mxu0 %v1279_v1 }
  0xd6   : > { %938 = vmatpush1.msra.mxu0 %v742_v19 }
  0xd7   : > { %939 = vmatprep.subr.mxu0 %v1279_v1 }
  0xd8   : > { %940 = vmatpush1.msra.mxu0 %v741_v36 }
  0xd9   : > { %941 = vmatprep.subr.mxu0 %v1279_v1 }
  0xda   : > { %942 = vmatpush1.msra.mxu0 %v740_v38 }
  0xdb   : > { %943 = vmatprep.subr.mxu0 %v1279_v1 }
  0xdc   : > { %944 = vmatpush1.msra.mxu0 %v739_v40  ;;  %v1016_v40 = vld [vmem:[%s1951_s2 + $0x190] sm:$0xff] }
  0xdd   : > { %973 = vmatprep.subr.mxu0 %v1279_v1 }
  0xde   : > { %974 = vmatpush2.msra.mxu0 %v756_v46 }
  0xdf   : > { %975 = vmatprep.subr.mxu0 %v1279_v1 }
  0xe0   : > { %976 = vmatpush2.msra.mxu0 %v755_v49  ;;  %v1014_v49 = vld [vmem:[%s1951_s2 + $0x180] sm:$0xff] }
 0x152   : > { %v517_v20 = vpop.f32.mrf.mxu1 }
 0x154   : > { %v519_v21 = vpop.f32.mrf.mxu1 }
 0x156   : > { %v522_v22 = vpop.f32.mrf.mxu1 }
 0x158   : > { %v524_v23 = vpop.f32.mrf.mxu1 }
 0x159   : > { %v423_v24 = vpop.f32.mrf.mxu0 }
 0x15a   : > { %v518_v41 = vadd.f32 %v517_v20, %v423_v24 }
 0x15b   : > { %v425_v25 = vpop.f32.mrf.mxu0  ;;  %v527_v26 = vpop.f32.mrf.mxu1 }
 0x15d   : > { %v428_v27 = vpop.f32.mrf.mxu0  ;;  %v529_v28 = vpop.f32.mrf.mxu1 }
 0x15e   : > { %v523_v50 = vadd.f32 %v522_v22, %v428_v27 }
 0x15f   : > { %v430_v29 = vpop.f32.mrf.mxu0  ;;  %v532_v30 = vpop.f32.mrf.mxu1 }
 0x161   : > { %v433_v31 = vpop.f32.mrf.mxu0  ;;  %v534_v32 = vpop.f32.mrf.mxu1 }
 0x162   : > { %v528_v58 = vadd.f32 %v527_v26, %v433_v31 }
 0x163   : > { %v435_v33 = vpop.f32.mrf.mxu0 }
 0x165   : > { %v438_v34 = vpop.f32.mrf.mxu0 }
 0x166   : > { %v533_v4 = vadd.f32 %v532_v30, %v438_v34 }
 0x167   : > { %v440_v35 = vpop.f32.mrf.mxu0 }
 0x168   : > { %v1017_v35 = vld [vmem:[%s1951_s2 + $0x198] sm:$0xff] }
 0x17d   : > { %v659_v42 = vpop.f32.mrf.mxu0 }
 0x17e   : > { %v678_v44 = vadd.f32 %v659_v42, %v518_v41 }
 0x17f   : > { %v661_v48 = vpop.f32.mrf.mxu0 }
 0x180   : > { %v687_v51 = vadd.f32 %v1241_v43, %v678_v44 }
 0x181   : > { %v664_v52 = vpop.f32.mrf.mxu0 }
 0x182   : > { %v691_v53 = vmax.f32 %v687_v51, 0.0  ;;  %v679_v54 = vadd.f32 %v664_v52, %v523_v50 }
 0x183   : > { %v666_v57 = vpop.f32.mrf.mxu0 }
 0x184   : > { %v699_v59 = vrot.slane %v691_v53, 6  ;;  %v688_v60 = vadd.f32 %v1241_v43, %v679_v54  ;;  %v1013_v54 = vld [vmem:[%s1951_s2 + $0x178] sm:$0xff] }
 0x185   : > { %v669_v61 = vpop.f32.mrf.mxu0 }
 0x186   : > { %v692_v62 = vmax.f32 %v688_v60, 0.0  ;;  %v680_v63 = vadd.f32 %v669_v61, %v528_v58  ;;  %706 = vrot.lane.b32.xlu1 %v699_v59, %s1280_s20  ;;  %v1011_v60 = vld [vmem:[%s1951_s2 + $0x168] sm:$0xff] }
 0x187   : > { %v671_v2 = vpop.f32.mrf.mxu0 }
 0x188   : > { %v700_v5 = vrot.slane %v692_v62, 6  ;;  %v689_v6 = vadd.f32 %v1241_v43, %v680_v63  ;;  %v1009_v2 = vld [vmem:[%s1951_s2 + $0x158] sm:$0xff] }
 0x189   : > { %v674_v7 = vpop.f32.mrf.mxu0 }
 0x18a   : > { %v693_v8 = vmax.f32 %v689_v6, 0.0  ;;  %v681_v9 = vadd.f32 %v674_v7, %v533_v4  ;;  %v701_v10 = vsel %vm229_vm3, %v699_v59, %v700_v5  ;;  %v1012_v59 = vld [vmem:[%s1951_s2 + $0x170] sm:$0xff]  ;;  %v1007_v4 = vld [vmem:[%s1951_s2 + $0x148] sm:$0xff]  ;;  %v1005_v6 = vld [vmem:[%s1951_s2 + $0x138] sm:$0xff] }
 0x18b   : > { %708 = vrot.lane.b32.xlu0 %v701_v10, %s1280_s20  ;;  %v676_v11 = vpop.f32.mrf.mxu0  ;;  %v1004_v7 = vld [vmem:[%s1951_s2 + $0x130] sm:$0xff]  ;;  %v1019_v10 = vld [vmem:[%s1951_s2 + $0x1a8] sm:$0xff] }
 0x18c   : > { %v702_v12 = vrot.slane %v693_v8, 6  ;;  %v690_v13 = vadd.f32 %v1241_v43, %v681_v9  ;;  %v1015_v43 = vld [vmem:[%s1951_s2 + $0x188] sm:$0xff]  ;;  %v1002_v9 = vld [vmem:[%s1951_s2 + $0x120] sm:$0xff] }
 0x18d   : > { %v1003_v8 = vld [vmem:[%s1951_s2 + $0x128] sm:$0xff] }
 0x18e   : > { %v694_v14 = vmax.f32 %v690_v13, 0.0  ;;  %v703_v15 = vsel %vm229_vm3, %v700_v5, %v702_v12  ;;  %v1006_v5 = vld [vmem:[%s1951_s2 + $0x140] sm:$0xff] }
 0x18f   : > { %710 = vrot.lane.b32.xlu1 %v703_v15, %s1280_s20 }
 0x190   : > { %v704_v16 = vrot.slane %v694_v14, 6  ;;  %v1018_v14 = vld [vmem:[%s1951_s2 + $0x1a0] sm:$0xff] }
 0x192   : > { %v705_v17 = vsel %vm229_vm3, %v702_v12, %v704_v16 }
 0x193   : > { %714 = vrot.lane.b32.xlu1 %v704_v16, %s1280_s20  ;;  %712 = vrot.lane.b32.xlu0 %v705_v17, %s1280_s20 }
 0x1f8   : > { %v707_v18 = vpop.permute.xlu1 %706 }
 0x1f9   : > { %721 = vst.msk [vmem:[#allocation2] sm:$0xfc] %vm252_vm7, %v707_v18 }
 0x1fa   : > { %722 = vst.msk [vmem:[#allocation2 + $0x8] sm:$0xfc] %vm254_vm8, %v707_v18 }
 0x1fd   : > { %v709_v19 = vpop.permute.xlu0 %708 }
 0x1fe   : > { %723 = vst.msk [vmem:[#allocation2 + $0x10] sm:$0xff] %vm256_vm9, %v709_v19 }
 0x1ff   : > { %724 = vst.msk [vmem:[#allocation2 + $0x18] sm:$0xff] %vm207_vm1, %v709_v19 }
 0x200   : > { %v731_v21 = vld [vmem:[#allocation2] sm:$0xff] }
 0x201   : > { %v732_v20 = vld [vmem:[#allocation2 + $0x8] sm:$0xff]  ;;  %v711_v22 = vpop.permute.xlu1 %710  ;;  %v757_v24 = vld [vmem:[#allocation2] sm:$0xfc] }
 0x202   : > { %1246 = vmatprep.mubr.msk.f32.mxu0 %vm348_vm10, %v732_v20  ;;  %725 = vst.msk [vmem:[#allocation2 + $0x20] sm:$0xff] %vm256_vm9, %v711_v22  ;;  %v758_v23 = vld [vmem:[#allocation2 + $0x8] sm:$0xfc]  ;;  %v789_v32 = vrot.slane %v757_v24, 2  ;;  %v998_v11 = vld [vmem:[#allocation2] sm:$0xf0] }
 0x203   : > { %726 = vst.msk [vmem:[#allocation2 + $0x28] sm:$0xff] %vm207_vm1, %v711_v22  ;;  %978 = vmatmul.mubr.f32.vlgmr.msra.gmra.mxu0 %v731_v21  ;;  %v792_v31 = vrot.slane %v758_v23, 2  ;;  %v999_v56 = vld [vmem:[#allocation2 + $0x8] sm:$0xf0]  ;;  %v1024_v15 = vrot.slane %v998_v11, 4 }
 0x204   : > { %v1027_v61 = vrot.slane %v999_v56, 4 }
 0x205   : > { %v715_v25 = vpop.permute.xlu1 %714  ;;  %v713_v26 = vpop.permute.xlu0 %712  ;;  %v1804_v28 = vld [vmem:[#allocation2 + $0x10] sm:$0xff] }
 0x206   : > { %v1802_v27 = vld [vmem:[#allocation2 + $0x18] sm:$0xff]  ;;  %729 = vst.msk [vmem:[#allocation2 + $0x40] sm:$0x3] %vm263_vm11, %v715_v25  ;;  %v790_v30 = vrot.slane %v1804_v28, 2  ;;  %v1025_v12 = vrot.slane %v1804_v28, 4 }
 0x207   : > { %730 = vst.msk [vmem:[#allocation2 + $0x48] sm:$0x3] %vm265_vm12, %v715_v25  ;;  %v793_v29 = vrot.slane %v1802_v27, 2  ;;  %1247 = vmatprep.mubr.msk.f32.mxu0 %vm348_vm10, %v1802_v27  ;;  %v1028_v57 = vrot.slane %v1802_v27, 4 }
 0x208   : > { %727 = vst.msk [vmem:[#allocation2 + $0x30] sm:$0xff] %vm256_vm9, %v713_v26  ;;  %983 = vmatmul.mubr.f32.gmra.mxu0 %v1804_v28  ;;  %v791_v34 = vsel %vm325_vm13, %v789_v32, %v790_v30  ;;  %v1026_v17 = vsel %vm562_vm14, %v1024_v15, %v1025_v12 }
 0x209   : > { %728 = vst.msk [vmem:[#allocation2 + $0x38] sm:$0xff] %vm207_vm1, %v713_v26  ;;  %v794_v33 = vsel %vm325_vm13, %v792_v31, %v793_v29  ;;  %v1823_v37 = vld [vmem:[#allocation2 + $0x20] sm:$0xff]  ;;  %v1029_v63 = vsel %vm562_vm14, %v1027_v61, %v1028_v57  ;;  %v1268_v61 = vld [vmem:[%s1368_s11 + $0x8] sm:$0xff] }
 0x20a   : > { %1242 = vmatprep.mubr.msk.f32.mxu1 %vm348_vm10, %v794_v33  ;;  %v1821_v36 = vld [vmem:[#allocation2 + $0x28] sm:$0xff]  ;;  %v795_v39 = vrot.slane %v1823_v37, 2  ;;  %v1030_v16 = vrot.slane %v1823_v37, 4 }
 0x20b   : > { %884 = vmatmul.mubr.f32.vlgmr.msra.gmra.mxu1 %v791_v34  ;;  %v797_v38 = vrot.slane %v1821_v36, 2  ;;  %1248 = vmatprep.mubr.msk.f32.mxu0 %vm348_vm10, %v1821_v36  ;;  %v1032_v13 = vrot.slane %v1821_v36, 4 }
 0x20c   : > { %1055 = vmatpush1.msra.mxu1 %v1017_v35  ;;  %988 = vmatmul.mubr.f32.gmra.mxu0 %v1823_v37  ;;  %v796_v42 = vsel %vm325_vm13, %v790_v30, %v795_v39  ;;  %v1031_v22 = vsel %vm562_vm14, %v1025_v12, %v1030_v16  ;;  %v1270_v12 = vld [vmem:[%s1368_s11 + $0x18] sm:$0xff] }
 0x20d   : > { %1056 = vmatprep.subr.mxu1 %v1279_v1  ;;  %v798_v41 = vsel %vm325_vm13, %v793_v29, %v797_v38  ;;  %v759_v50 = vld [vmem:[#allocation2 + $0x40] sm:$0x3]  ;;  %v1033_v19 = vsel %vm562_vm14, %v1028_v57, %v1032_v13 }
 0x20e   : > { %1057 = vmatpush1.msra.mxu1 %v1016_v40  ;;  %1243 = vmatprep.mubr.msk.f32.mxu1 %vm348_vm10, %v798_v41  ;;  %v760_v46 = vld [vmem:[#allocation2 + $0x48] sm:$0x3]  ;;  %v803_v55 = vrot.slane %v759_v50, 2  ;;  %v1000_v24 = vld [vmem:[#allocation2 + $0x40] sm:$0xf] }
 0x20f   : > { %v1842_v45 = vld [vmem:[#allocation2 + $0x30] sm:$0xff]  ;;  %1058 = vmatprep.subr.mxu1 %v1279_v1  ;;  %889 = vmatmul.mubr.f32.gmra.mxu1 %v796_v42  ;;  %v805_v51 = vrot.slane %v760_v46, 2  ;;  %v1001_v20 = vld [vmem:[#allocation2 + $0x48] sm:$0xf]  ;;  %v1038_v26 = vrot.slane %v1000_v24, 4 }
 0x210   : > { %v1840_v44 = vld [vmem:[#allocation2 + $0x38] sm:$0xff]  ;;  %v799_v48 = vrot.slane %v1842_v45, 2  ;;  %1059 = vmatpush1.msra.mxu1 %v1015_v43  ;;  %v1034_v21 = vrot.slane %v1842_v45, 4  ;;  %v1040_v23 = vrot.slane %v1001_v20, 4 }
 0x211   : > { %v801_v47 = vrot.slane %v1840_v44, 2  ;;  %1249 = vmatprep.mubr.msk.f32.mxu0 %vm348_vm10, %v1840_v44  ;;  %1060 = vmatprep.subr.mxu1 %v1279_v1  ;;  %v1036_v18 = vrot.slane %v1840_v44, 4 }
 0x212   : > { %993 = vmatmul.mubr.f32.gmra.mxu0 %v1842_v45  ;;  %v800_v53 = vsel %vm325_vm13, %v795_v39, %v799_v48  ;;  %1061 = vmatpush1.msra.mxu1 %v1014_v49  ;;  %v804_v62 = vsel %vm325_vm13, %v799_v48, %v803_v55  ;;  %v1035_v25 = vsel %vm562_vm14, %v1030_v16, %v1034_v21 }
 0x213   : > { %v802_v52 = vsel %vm325_vm13, %v797_v38, %v801_v47  ;;  %1062 = vmatprep.subr.mxu1 %v1279_v1  ;;  %v806_v58 = vsel %vm325_vm13, %v801_v47, %v805_v51  ;;  %v1041_v27 = vsel %vm562_vm14, %v1036_v18, %v1040_v23  ;;  %v1039_v28 = vsel %vm562_vm14, %v1034_v21, %v1038_v26  ;;  %v1254_v47 = vld [vmem:[%s1952_s3 + $0x1] ss:$0 sm:$0xff] }
 0x214   : > { %1244 = vmatprep.mubr.msk.f32.mxu1 %vm348_vm10, %v802_v52  ;;  %1063 = vmatpush1.msra.mxu1 %v1013_v54 }
 0x215   : > { %894 = vmatmul.mubr.f32.gmra.mxu1 %v800_v53  ;;  %1064 = vmatprep.subr.mxu1 %v1279_v1  ;;  %v1267_v53 = vld [vmem:[%s1368_s11] sm:$0xff] }
 0x216   : > { %1245 = vmatprep.mubr.msk.f32.mxu1 %vm348_vm10, %v806_v58  ;;  %1065 = vmatpush1.msra.mxu1 %v1012_v59 }
 0x217   : > { %1066 = vmatprep.subr.mxu1 %v1279_v1 }
 0x218   : > { %1067 = vmatpush1.msra.mxu1 %v1011_v60 }
 0x219   : > { %899 = vmatmul.mubr.f32.gmra.mxu1 %v804_v62  ;;  %1068 = vmatprep.subr.mxu1 %v1279_v1 }
 0x21a   : > { %1250 = vmatprep.mubr.msk.f32.mxu1 %vm348_vm10, %v1029_v63  ;;  %1069 = vmatpush1.msra.mxu1 %v1010_v0 }
 0x21b   : > { %1070 = vmatprep.subr.mxu1 %v1279_v1 }
 0x21c   : > { %1071 = vmatpush1.msra.mxu1 %v1009_v2 }
 0x21d   : > { %1072 = vmatprep.subr.mxu1 %v1279_v1 }
 0x21e   : > { %1073 = vmatpush1.msra.mxu1 %v1008_v3 }
 0x21f   : > { %1074 = vmatprep.subr.mxu1 %v1279_v1 }
 0x220   : > { %1075 = vmatpush1.msra.mxu1 %v1007_v4 }
 0x221   : > { %1076 = vmatprep.subr.mxu1 %v1279_v1 }
 0x222   : > { %1077 = vmatpush1.msra.mxu1 %v1006_v5 }
 0x223   : > { %1078 = vmatprep.subr.mxu1 %v1279_v1 }
 0x224   : > { %1079 = vmatpush1.msra.mxu1 %v1005_v6  ;;  %v1269_v6 = vld [vmem:[%s1368_s11 + $0x10] sm:$0xff] }
 0x225   : > { %1080 = vmatprep.subr.mxu1 %v1279_v1 }
 0x226   : > { %1081 = vmatpush1.msra.mxu1 %v1004_v7 }
 0x227   : > { %1082 = vmatprep.subr.mxu1 %v1279_v1 }
 0x228   : > { %1083 = vmatpush1.msra.mxu1 %v1003_v8 }
 0x229   : > { %1084 = vmatprep.subr.mxu1 %v1279_v1 }
 0x22a   : > { %1085 = vmatpush1.msra.mxu1 %v1002_v9 }
 0x22b   : > { %1114 = vmatprep.subr.mxu1 %v1279_v1 }
 0x22c   : > { %1115 = vmatpush2.msra.mxu1 %v1019_v10 }
 0x22d   : > { %1116 = vmatprep.subr.mxu1 %v1279_v1  ;;  %v1037_v1 = vsel %vm562_vm14, %v1032_v13, %v1036_v18 }
 0x22e   : > { %1117 = vmatpush2.msra.mxu1 %v1018_v14 }
 0x22f   : > { %1119 = vmatmul.mubr.f32.vlgmr.msra.gmra.mxu1 %v1026_v17 }
 0x230   : > { %1251 = vmatprep.mubr.msk.f32.mxu1 %vm348_vm10, %v1033_v19 }
 0x233   : > { %1124 = vmatmul.mubr.f32.gmra.mxu1 %v1031_v22 }
 0x234   : > { %1252 = vmatprep.mubr.msk.f32.mxu1 %vm348_vm10, %v1037_v1 }
 0x237   : > { %1129 = vmatmul.mubr.f32.gmra.mxu1 %v1035_v25 }
 0x238   : > { %1253 = vmatprep.mubr.msk.f32.mxu1 %vm348_vm10, %v1041_v27 }
 0x23b   : > { %1134 = vmatmul.mubr.f32.gmra.mxu1 %v1039_v28 }
 0x2c3   : > { %v979_v29 = vpop.f32.mrf.mxu0 }
 0x2c5   : > { %v981_v30 = vpop.f32.mrf.mxu0 }
 0x2c8   : > { %v984_v31 = vpop.f32.mrf.mxu0 }
 0x2ca   : > { %v986_v32 = vpop.f32.mrf.mxu0 }
 0x2cb   : > { %v885_v33 = vpop.f32.mrf.mxu1 }
 0x2cc   : > { %v989_v34 = vpop.f32.mrf.mxu0  ;;  %v980_v45 = vadd.f32 %v979_v29, %v885_v33 }
 0x2cd   : > { %v887_v35 = vpop.f32.mrf.mxu1 }
 0x2ce   : > { %v991_v36 = vpop.f32.mrf.mxu0 }
 0x2cf   : > { %v890_v37 = vpop.f32.mrf.mxu1 }
 0x2d0   : > { %v985_v50 = vadd.f32 %v984_v31, %v890_v37 }
 0x2d1   : > { %v892_v39 = vpop.f32.mrf.mxu1 }
 0x2d2   : > { %v994_v38 = vpop.f32.mrf.mxu0 }
 0x2d4   : > { %v996_v40 = vpop.f32.mrf.mxu0 }
 0x2d5   : > { %v895_v41 = vpop.f32.mrf.mxu1 }
 0x2d6   : > { %v990_v57 = vadd.f32 %v989_v34, %v895_v41 }
 0x2d7   : > { %v897_v42 = vpop.f32.mrf.mxu1 }
 0x2d9   : > { %v900_v43 = vpop.f32.mrf.mxu1 }
 0x2da   : > { %v995_v2 = vadd.f32 %v994_v38, %v900_v43 }
 0x2db   : > { %v902_v44 = vpop.f32.mrf.mxu1 }
 0x2ef   : > { %v1120_v46 = vpop.f32.mrf.mxu1 }
 0x2f0   : > { %v1139_v48 = vadd.f32 %v1120_v46, %v980_v45 }
 0x2f1   : > { %v1122_v49 = vpop.f32.mrf.mxu1 }
 0x2f2   : > { %v1148_v51 = vadd.f32 %v1254_v47, %v1139_v48 }
 0x2f3   : > { %v1125_v52 = vpop.f32.mrf.mxu1 }
 0x2f4   : > { %v1152_v54 = vadd.f32 %v1267_v53, %v1148_v51  ;;  %v1140_v55 = vadd.f32 %v1125_v52, %v985_v50 }
 0x2f5   : > { %v1127_v56 = vpop.f32.mrf.mxu1 }
 0x2f6   : > { %v1156_v58 = vmax.f32 %v1152_v54, 0.0  ;;  %v1149_v59 = vadd.f32 %v1254_v47, %v1140_v55 }
 0x2f7   : > { %v1130_v60 = vpop.f32.mrf.mxu1 }
 0x2f8   : > { %1160 = vst [vmem:[%s199_s5] sm:$0xff] %v1156_v58  ;;  %v1153_v62 = vadd.f32 %v1268_v61, %v1149_v59  ;;  %v1141_v63 = vadd.f32 %v1130_v60, %v990_v57 }
 0x2f9   : > { %v1132_v0 = vpop.f32.mrf.mxu1 }
 0x2fa   : > { %v1157_v3 = vmax.f32 %v1153_v62, 0.0  ;;  %v1150_v4 = vadd.f32 %v1254_v47, %v1141_v63 }
 0x2fb   : > { %v1135_v5 = vpop.f32.mrf.mxu1 }
 0x2fc   : > { %1161 = vst [vmem:[%s199_s5 + $0x8] sm:$0xff] %v1157_v3  ;;  %v1154_v7 = vadd.f32 %v1269_v6, %v1150_v4  ;;  %v1142_v8 = vadd.f32 %v1135_v5, %v995_v2 }
 0x2fd   : > { %v1137_v9 = vpop.f32.mrf.mxu1 }
 0x2fe   : > { %v1158_v10 = vmax.f32 %v1154_v7, 0.0  ;;  %v1151_v11 = vadd.f32 %v1254_v47, %v1142_v8 }
 0x300   : > { %1162 = vst [vmem:[%s199_s5 + $0x10] sm:$0xff] %v1158_v10  ;;  %v1155_v13 = vadd.f32 %v1270_v12, %v1151_v11 }
 0x302   : > { %v1159_v14 = vmax.f32 %v1155_v13, 0.0 }
 0x304   : > { %1163 = vst [vmem:[%s199_s5 + $0x18] sm:$0xff] %v1159_v14 }
 0x305 PF: > { %s14_s15 = sadd.s32 1, %s1277_s15  }
 0x306   : > { %p11_p4 = scmp.ge.s32.totalorder %s14_s15, 4  }
 0x308   :  { %13 = sbr.rel (!%p11_p4) target bundleno = 1 (0x1), region = 66 }

</bundles_post_ra>
